<compile_context>
chip_gen: v7x
topology: tpu7x:2x2x1
jax: 0.10.0
libtpu: 0.0.40
codegen_flags: <defaults>
</compile_context>

<pallas_src>
import functools

import jax
import jax.numpy as jnp
from jax.experimental import pallas as pl
from jax.experimental.pallas import tpu as pltpu


def _attention_kernel(x_ref, w_ref, b_ref, ctx_ref, attn_ref, *, approx_recip):
    # x_ref:    (TB, S, H) VMEM block (TB batch rows per grid step), native dtype
    # w_ref:    (1, H)     VMEM, lane-dense projection weights (shared across steps)
    # b_ref:    (1, 1)     SMEM, scalar bias (f32)
    # ctx_ref:  (TB, H)    output block (lane-dense)
    # attn_ref: (TB, S)    output block (lane-dense; reshaped to (B, S, 1) in the wrapper)
    x = x_ref[...]                                   # (TB, S, H), native dtype (no upcast)
    w = w_ref[...].astype(x.dtype)                   # (1, H) -> broadcasts over (TB, S, H)
    b = b_ref[0, 0]                                  # scalar bias (SMEM, f32)

    # scores[b, s] = sum_h x[b,s,h] * w[h] + bias.  Elementwise multiply in native dtype
    # (bf16 VPU on v6e/v7x); the lane (H) reduction accumulates in f32.  keepdims keeps S
    # on the sublane axis so the softmax output feeds the weighted sum without a relayout.
    scores = jnp.sum(x * w, axis=-1, keepdims=True, dtype=jnp.float32) + b   # (TB, S, 1)

    # Softmax over the sequence axis (axis=1 == PyTorch dim=1), all in f32.
    m = jnp.max(scores, axis=1, keepdims=True)        # (TB, 1, 1)
    e = jnp.exp(scores - m)                           # (TB, S, 1)
    denom = jnp.sum(e, axis=1, keepdims=True)         # (TB, 1, 1)
    if approx_recip:
        attn = e * pl.reciprocal(denom, approx=True)  # EUP slot, otherwise idle
    else:
        attn = e / denom                              # exact
    # attn: (TB, S, 1) f32, S on sublanes

    # context[b, h] = sum_s attn[b,s] * x[b,s,h]: elementwise in native dtype (lane
    # broadcast of attn over H), sublane (S) reduction accumulated in f32.
    ctx = jnp.sum(attn.astype(x.dtype) * x, axis=1, dtype=jnp.float32)        # (TB, H)
    ctx_ref[...] = ctx.astype(ctx_ref.dtype)

    # Single relayout of the small weights tensor for the lane-dense (TB, S) store.
    attn_ref[...] = attn[:, :, 0].astype(attn_ref.dtype)


def _tpu_config():
    """(target_block_bytes, vmem_limit_bytes, min_grid_steps) per TPU generation."""
    try:
        kind = jax.devices()[0].device_kind.lower()
    except Exception:
        kind = ""
    if "v7" in kind or "7x" in kind:
        # 64 MiB VMEM per TC, ~3.2 TB/s HBM, 2 TensorCores: medium blocks, headroom in the
        # scoped limit, and >= 2 grid steps so "parallel" can shard the batch across TCs.
        return 8 << 20, 48 << 20, 2
    if "v6" in kind:
        # 128 MiB physical VMEM, ~1.4 TB/s HBM: bigger blocks + raised scoped limit.
        return 12 << 20, 96 << 20, 1
    if "v5e" in kind or "v5 lite" in kind or "v5lite" in kind:
        # 128 MiB physical VMEM (16 MiB default scoped): keep blocks large, raise limit.
        return 8 << 20, 96 << 20, 1
    # Unknown / other TPU: conservative block size, default scoped VMEM.
    return 4 << 20, None, 1


def attention_layer(lstm_output, w, b, *, block_b=None, target_block_bytes=None,
                    approx_reciprocal=False):
    """lstm_output: (B, S, H); w: (H, 1) Linear weight (transposed); b: bias (1,) or (1, 1).

    Returns (context (B, H), attention_weights (B, S, 1)), matching the PyTorch module.
    """
    B, S, H = lstm_output.shape
    dtype = lstm_output.dtype
    itemsize = jnp.dtype(dtype).itemsize

    cfg_block_bytes, vmem_limit, min_grid_steps = _tpu_config()
    if target_block_bytes is None:
        target_block_bytes = cfg_block_bytes

    # Lane-dense layout for the tiny parameters; bias as an f32 scalar in SMEM.
    w_row = w.reshape(1, H)
    b_2d = jnp.asarray(b, dtype=jnp.float32).reshape(1, 1)

    # Packed sublane tile of the I/O dtype: 8 (f32), 16 (bf16), 32 (int8/fp8).
    sub = max(8, 32 // max(1, itemsize))

    # --- choose TB (batch rows per grid step) --------------------------------------
    if block_b is not None:
        tb = max(sub, (int(block_b) // sub) * sub)
    else:
        row_bytes = max(1, S * H * itemsize)
        tb = max(sub, (target_block_bytes // row_bytes) // sub * sub)
    if B <= sub:
        tb = B                                   # single exact block, no masking needed
    else:
        tb = min(tb, (B // sub) * sub)           # keep tb a multiple of the sublane tile
        if min_grid_steps > 1:
            cap = max(sub, (pl.cdiv(B, min_grid_steps) // sub) * sub)
            tb = min(tb, cap)                    # guarantee >= min_grid_steps grid steps
        tb = max(tb, sub)
    # TODO(synk): add an S-tiled two-pass / online-softmax path (second "arbitrary" grid
    # axis with a (tb, H) f32 accumulator via pl.when) for shapes where even tb == sub
    # exceeds the VMEM block budget (very long S * wide H; most acute on v7x's 64 MiB).

    b_main = (B // tb) * tb                      # rows covered by the exact main grid
    rem = B - b_main                             # ragged tail rows (< tb)

    cp_kwargs = dict(dimension_semantics=("parallel",))
    if vmem_limit is not None:
        cp_kwargs["vmem_limit_bytes"] = int(vmem_limit)
    compiler_params = pltpu.CompilerParams(**cp_kwargs)

    kernel = functools.partial(_attention_kernel, approx_recip=approx_reciprocal)

    def _call(x_in, n_rows, tb_):
        grid_spec = pltpu.PrefetchScalarGridSpec(
            num_scalar_prefetch=0,
            grid=(n_rows // tb_,),
            in_specs=[
                pl.BlockSpec((tb_, S, H), lambda i: (i, 0, 0)),        # batched input slab
                pl.BlockSpec((1, H), lambda i: (0, 0)),                # shared weights
                pl.BlockSpec(memory_space=pltpu.MemorySpace.SMEM),     # scalar bias
            ],
            out_specs=[
                pl.BlockSpec((tb_, H), lambda i: (i, 0)),              # context (lane-dense)
                pl.BlockSpec((tb_, S), lambda i: (i, 0)),              # weights (lane-dense)
            ],
        )
        return pl.pallas_call(
            kernel,
            out_shape=(
                jax.ShapeDtypeStruct((n_rows, H), dtype),
                jax.ShapeDtypeStruct((n_rows, S), dtype),
            ),
            grid_spec=grid_spec,
            compiler_params=compiler_params,
        )(x_in, w_row, b_2d)

    # Main grid: exact tb-sized blocks over the first b_main rows of the *original* array
    # (blocks never address the tail rows, so no padding and no copy of the big input).
    ctx, attn = _call(lstm_output, b_main, tb)

    # Ragged tail: one tiny extra pallas_call over just the sliced tail rows (< tb).
    if rem > 0:
        x_tail = jax.lax.slice_in_dim(lstm_output, b_main, B, axis=0)
        ctx_t, attn_t = _call(x_tail, rem, rem)
        ctx = jnp.concatenate([ctx, ctx_t], axis=0)      # small (B,H)/(B,S) outputs only
        attn = jnp.concatenate([attn, attn_t], axis=0)

    return ctx, attn.reshape(B, S, 1)


def _reference(lstm_output, w, b):
    scores = jnp.einsum("bsh,ho->bso", lstm_output, w) + b[0, 0]
    weights = jax.nn.softmax(scores, axis=1)
    context = jnp.sum(weights * lstm_output, axis=1)
    return context, weights


if __name__ == "__main__":
    key = jax.random.PRNGKey(0)
    B, S, H = 2, 8, 32  # batch, seq, hidden

    k_x, k_w, k_b = jax.random.split(key, 3)
    lstm_output = jax.random.normal(k_x, (B, S, H), dtype=jnp.float32)
    # Deterministic "nn.Linear(hidden, 1)" parameters (synthetic init).
    w = jax.random.normal(k_w, (H, 1), dtype=jnp.float32) * (1.0 / jnp.sqrt(H))
    b = jax.random.normal(k_b, (1, 1), dtype=jnp.float32) * 0.01

    context, attn_weights = attention_layer(lstm_output, w, b)
    jax.block_until_ready((context, attn_weights))

    ctx_ref, attn_ref = _reference(lstm_output, w, b)
    assert context.shape == (B, H)
    assert attn_weights.shape == (B, S, 1)
    assert jnp.allclose(context, ctx_ref, atol=1e-5, rtol=1e-5)
    assert jnp.allclose(attn_weights, attn_ref, atol=1e-5, rtol=1e-5)

    print("KERNEL_OK")
</pallas_src>

<mosaic_0001>
module attributes {stable_mosaic.version = 11 : i64} {
  func.func @_attention_kernel(%arg0: i32, %arg1: memref<2x8x32xf32, #tpu.memory_space<vmem>>, %arg2: memref<1x32xf32, #tpu.memory_space<vmem>>, %arg3: memref<1x1xf32, #tpu.memory_space<smem>>, %arg4: memref<2x32xf32, #tpu.memory_space<vmem>>, %arg5: memref<2x8xf32, #tpu.memory_space<vmem>>) attributes {dimension_semantics = [#tpu.dimension_semantics<parallel>], iteration_bounds = array<i64: 1>, scalar_prefetch = 0 : i64, scratch_operands = 0 : i64, tpu.core_type = #tpu.core_type<tc>, window_params = [{transform_indices = @transform_0, window_bounds = array<i64: 2, 8, 32>}, {pipeline_mode = #tpu.pipeline_mode<synchronous>, transform_indices = @transform_1, window_bounds = array<i64: 1, 32>}, {transform_indices = @transform_2, window_bounds = array<i64: 1, 1>}, {transform_indices = @transform_3, window_bounds = array<i64: 2, 32>}, {transform_indices = @transform_4, window_bounds = array<i64: 2, 8>}]} {
    %c0 = arith.constant 0 : index
    %c0_0 = arith.constant 0 : index
    %c0_1 = arith.constant 0 : index
    %0 = vector.load %arg1[%c0, %c0_0, %c0_1] : memref<2x8x32xf32, #tpu.memory_space<vmem>>, vector<2x8x32xf32>
    %c0_2 = arith.constant 0 : index
    %c0_3 = arith.constant 0 : index
    %1 = vector.load %arg2[%c0_2, %c0_3] : memref<1x32xf32, #tpu.memory_space<vmem>>, vector<1x32xf32>
    %c0_4 = arith.constant 0 : index
    %c0_5 = arith.constant 0 : index
    %2 = memref.load %arg3[%c0_4, %c0_5] : memref<1x1xf32, #tpu.memory_space<smem>>
    %3 = vector.shape_cast %1 : vector<1x32xf32> to vector<1x1x32xf32>
    %4 = vector.broadcast %3 : vector<1x1x32xf32> to vector<2x8x32xf32>
    %5 = arith.mulf %0, %4 : vector<2x8x32xf32>
    %cst = arith.constant dense<0.000000e+00> : vector<2x8xf32>
    %6 = vector.multi_reduction <add>, %5, %cst [2] : vector<2x8x32xf32> to vector<2x8xf32>
    %7 = vector.shape_cast %6 : vector<2x8xf32> to vector<2x8x1xf32>
    %8 = vector.broadcast %2 : f32 to vector<2x8x1xf32>
    %9 = arith.addf %7, %8 : vector<2x8x1xf32>
    %cst_6 = arith.constant dense<0xFF800000> : vector<2x1xf32>
    %10 = vector.multi_reduction <maximumf>, %9, %cst_6 [1] : vector<2x8x1xf32> to vector<2x1xf32>
    %11 = vector.shape_cast %10 : vector<2x1xf32> to vector<2x1x1xf32>
    %12 = vector.broadcast %11 : vector<2x1x1xf32> to vector<2x8x1xf32>
    %13 = arith.subf %9, %12 : vector<2x8x1xf32>
    %14 = math.exp %13 : vector<2x8x1xf32>
    %cst_7 = arith.constant dense<0.000000e+00> : vector<2x1xf32>
    %15 = vector.multi_reduction <add>, %14, %cst_7 [1] : vector<2x8x1xf32> to vector<2x1xf32>
    %16 = vector.shape_cast %15 : vector<2x1xf32> to vector<2x1x1xf32>
    %17 = vector.broadcast %16 : vector<2x1x1xf32> to vector<2x8x1xf32>
    %18 = arith.divf %14, %17 : vector<2x8x1xf32>
    %19 = vector.broadcast %18 : vector<2x8x1xf32> to vector<2x8x32xf32>
    %20 = arith.mulf %19, %0 : vector<2x8x32xf32>
    %cst_8 = arith.constant dense<0.000000e+00> : vector<2x32xf32>
    %21 = vector.multi_reduction <add>, %20, %cst_8 [1] : vector<2x8x32xf32> to vector<2x32xf32>
    %c0_9 = arith.constant 0 : index
    %c0_10 = arith.constant 0 : index
    %22 = vector.load %arg4[%c0_9, %c0_10] : memref<2x32xf32, #tpu.memory_space<vmem>>, vector<2x32xf32>
    tpu.vector_store %arg4[%c0_9, %c0_10], %21 {strides = array<i32>} : memref<2x32xf32, #tpu.memory_space<vmem>>, vector<2x32xf32>,
    %23 = vector.shape_cast %18 : vector<2x8x1xf32> to vector<2x8xf32>
    %c0_11 = arith.constant 0 : index
    %c0_12 = arith.constant 0 : index
    %24 = vector.load %arg5[%c0_11, %c0_12] : memref<2x8xf32, #tpu.memory_space<vmem>>, vector<2x8xf32>
    tpu.vector_store %arg5[%c0_11, %c0_12], %23 {strides = array<i32>} : memref<2x8xf32, #tpu.memory_space<vmem>>, vector<2x8xf32>,
    return
  }
  func.func @transform_0(%arg0: i32) -> (i32, i32, i32) {
    %c0_i32 = arith.constant 0 : i32
    %c0_i32_0 = arith.constant 0 : i32
    %c0_i32_1 = arith.constant 0 : i32
    return %arg0, %c0_i32, %c0_i32_0 : i32, i32, i32
  }
  func.func @transform_1(%arg0: i32) -> (i32, i32) {
    %c0_i32 = arith.constant 0 : i32
    %c0_i32_0 = arith.constant 0 : i32
    %c0_i32_1 = arith.constant 0 : i32
    return %c0_i32, %c0_i32_0 : i32, i32
  }
  func.func @transform_2(%arg0: i32) -> (i32, i32) {
    %c0_i32 = arith.constant 0 : i32
    %c0_i32_0 = arith.constant 0 : i32
    %c0_i32_1 = arith.constant 0 : i32
    return %c0_i32, %c0_i32_0 : i32, i32
  }
  func.func @transform_3(%arg0: i32) -> (i32, i32) {
    %c0_i32 = arith.constant 0 : i32
    %c0_i32_0 = arith.constant 0 : i32
    return %arg0, %c0_i32 : i32, i32
  }
  func.func @transform_4(%arg0: i32) -> (i32, i32) {
    %c0_i32 = arith.constant 0 : i32
    %c0_i32_0 = arith.constant 0 : i32
    return %arg0, %c0_i32 : i32, i32
  }
}

</mosaic_0001>

<bundles_post_ra>
// kernel: tpu_custom_call.1
= control target key start
LH: loop header
LB: loop body
LE: loop exit
PB: predicated region body
PF: predicated region fallthrough
CT: control target
= control target key end

     0   :  { %11 = vsyncpa [#allocation4], 0  ;;  %s321_s0 = inlined_call_operand.hbm [shape: f32[2,8,32], index: 0, kind: input, shape index: {}]   ;;  %s322_s1 = inlined_call_operand.vmem [shape: f32[1,32], index: 1, kind: input, shape index: {}]   ;;  %s323_s2 = inlined_call_operand.<no memory space> [shape: f32[1,1], index: 2, kind: input, shape index: {}]   ;;  %s324_s3 = inlined_call_operand.hbm [shape: f32[2,32], index: 3, kind: output, shape index: {0}]   ;;  %s325_s4 = inlined_call_operand.hbm [shape: f32[2,8], index: 4, kind: output, shape index: {1}]  }
   0x1   :  { %12 = vsyncpa [#allocation5], 0 }
   0x2   :  { %13 = vsyncpa [#allocation8], 0  ;;  %s243_s15 = smov [#allocation3]   ;;  %s171_s19 = scalar_lea.hbm %s321_s0, 256 }
   0x3   :  { %s19_s16 = sshll.u32 %s243_s15, 4  ;;  %p172_p0 = scmp.ne.s32.totalorder %s321_s0, %s171_s19  ;;  %s20_s16 = int_to_ptr.vmem [resolvable:$true] %s19_s16 }
   0x4   :  { %p175_p1 = scmp.lt.u32.totalorder %s171_s19, %s321_s0 }
   0x6   :  { %p177_p2 = pnand %p175_p1, %p172_p0 }
   0x8   :  { %180 = shalt.err (!%p177_p2)
}
   0x9   :  { %s181_s24 = scalar_lea.vmem %s20_s16, 256  ;;  %p186_p4 = scmp.lt.s32.totalorder %s20_s16, %s20_s16 }
   0xa   :  { %p182_p3 = scmp.ne.s32.totalorder %s20_s16, %s181_s24  ;;  %p187_p5 = scmp.lt.s32.totalorder %s181_s24, %s181_s24 }
   0xc   :  { %p188_p6 = por %p187_p5, %p186_p4 }
   0xe   :  { %p189_p7 = pnand %p188_p6, %p182_p3 }
  0x10   :  { %192 = shalt.err (!%p189_p7)
}
  0x11   :  { %s244_s25 = smov 128   ;;  %s245_s26 = smov 8  }
  0x12   :  { %25 = dma.hbm_to_vmem [thread:$0]  %s321_s0, 256, %s20_s16, [#allocation4], %s244_s25, %s244_s25, %s245_s26  }
  0x13   :  { %237 = dma.done.wait [#allocation4], 256  }
  0x14   :  { %238 = vsyncadd [#allocation4], 4294967040  ;;  %v33_v0 = vld [vmem:[#allocation3] sm:$0xff]  ;;  %vm45_vm0 = vcmask 261120   ;;  %v34_v2 = vld [vmem:[#allocation3 + $0x8] sm:$0xff]  ;;  %v52_v7 = vstv %s323_s2  ;;  %v114_v42 = vlaneseq  ;;  %s246_s0 = smov [#allocation7]  }
  0x15   :  { %v157_v1 = vld [vmem:[%s322_s1] ss:$0 sm:$0xff]  ;;  %s144_s1 = sshll.u32 %s246_s0, 4  ;;  %vm107_vm1 = vcmask 1041409   ;;  %vm126_vm2 = vcmask 58368   ;;  %s145_s1 = int_to_ptr.vmem [resolvable:$true] %s144_s1 }
  0x16   :  { %v43_v3 = vmul.f32 %v157_v1, %v33_v0  ;;  %v44_v4 = vmul.f32 %v157_v1, %v34_v2  ;;  %v115_v43 = vand.u32 127, %v114_v42  ;;  %v117_v44 = vshrl.u32 %v114_v42, 7  ;;  %s193_s2 = scalar_lea.vmem %s145_s1, 32  ;;  %p198_p9 = scmp.lt.s32.totalorder %s145_s1, %s145_s1 }
  0x17   :  { %p194_p8 = scmp.ne.s32.totalorder %s145_s1, %s193_s2  ;;  %p199_p10 = scmp.lt.s32.totalorder %s193_s2, %s193_s2 }
  0x18   :  { %v46_v5 = vsel %vm45_vm0, %v43_v3, 0.0  ;;  %v49_v6 = vsel %vm45_vm0, %v44_v4, 0.0  ;;  %v118_v48 = vsub.s32 %v115_v43, %v117_v44 }
  0x19   :  { %47 = vadd.xlane.f32.xlu0 %v46_v5  ;;  %p200_p11 = por %p199_p10, %p198_p9 }
  0x1b   :  { %p201_p12 = pnand %p200_p11, %p194_p8 }
  0x1d   :  { %50 = vadd.xlane.f32.xlu0 %v49_v6 }
  0xa6   :  { %v48_v8 = vpop.xlane.xlu0 %47 }
  0xa7   :  { %v53_v9 = vadd.f32 %v52_v7, %v48_v8 }
  0xa9   :  { %v55_v10 = vrot.slane %v53_v9, 4 }
  0xaa   :  { %v51_v11 = vpop.xlane.xlu0 %50 }
  0xab   :  { %v56_v12 = vmax.f32 %v53_v9, %v55_v10  ;;  %v54_v13 = vadd.f32 %v52_v7, %v51_v11 }
  0xad   :  { %v57_v14 = vrot.slane %v56_v12, 2  ;;  %v61_v15 = vrot.slane %v54_v13, 4 }
  0xaf   :  { %v58_v16 = vmax.f32 %v56_v12, %v57_v14  ;;  %v62_v17 = vmax.f32 %v54_v13, %v61_v15 }
  0xb1   :  { %v59_v18 = vrot.slane %v58_v16, 1  ;;  %v63_v19 = vrot.slane %v62_v17, 2 }
  0xb3   :  { %v60_v20 = vmax.f32 %v58_v16, %v59_v18  ;;  %v64_v21 = vmax.f32 %v62_v17, %v63_v19 }
  0xb5   :  { %v67_v22 = vsub.f32 %v53_v9, %v60_v20  ;;  %v65_v23 = vrot.slane %v64_v21, 1 }
  0xb7   :  { %v69_v24 = vmul.f32 1.442695, %v67_v22  ;;  %v66_v25 = vmax.f32 %v64_v21, %v65_v23 }
  0xb9   :  { %163 = vpow2.f32 %v69_v24  ;;  %v68_v26 = vsub.f32 %v54_v13, %v66_v25 }
  0xbb   :  { %v71_v27 = vmul.f32 1.442695, %v68_v26 }
  0xbd   :  { %165 = vpow2.f32 %v71_v27 }
  0xc3   :  { %v164_v28 = vpop.eup %163 }
  0xc4   :  { %v73_v29 = vrot.slane %v164_v28, 4 }
  0xc6   :  { %v74_v30 = vadd.f32 %v164_v28, %v73_v29 }
  0xc7   :  { %v166_v31 = vpop.eup %165 }
  0xc8   :  { %v75_v32 = vrot.slane %v74_v30, 2  ;;  %v79_v33 = vrot.slane %v166_v31, 4 }
  0xca   :  { %v80_v34 = vadd.f32 %v166_v31, %v79_v33  ;;  %v76_v35 = vadd.f32 %v75_v32, %v74_v30 }
  0xcc   :  { %v81_v36 = vrot.slane %v80_v34, 2  ;;  %v77_v37 = vrot.slane %v76_v35, 1 }
  0xce   :  { %v78_v38 = vadd.f32 %v77_v37, %v76_v35  ;;  %v82_v39 = vadd.f32 %v81_v36, %v80_v34 }
  0xd0   :  { %v83_v40 = vrot.slane %v82_v39, 1  ;;  %167 = vrcp.f32 %v78_v38 }
  0xd2   :  { %v84_v41 = vadd.f32 %v83_v40, %v82_v39 }
  0xd4   :  { %169 = vrcp.f32 %v84_v41 }
  0xda   :  { %v168_v45 = vpop.eup %167 }
  0xdb   :  { %v86_v46 = vmul.f32 %v168_v45, %v164_v28 }
  0xdd   :  { %v89_v47 = vmul.f32 %v86_v46, %v33_v0  ;;  %v119_v54 = vrot.slane %v86_v46, %v118_v48 }
  0xde   :  { %v170_v49 = vpop.eup %169 }
  0xdf   :  { %v88_v50 = vmul.f32 %v170_v49, %v166_v31  ;;  %v91_v51 = vsel %vm45_vm0, %v89_v47, 0.0 }
  0xe0   :  { %v92_v52 = vrot.slane %v91_v51, 4 }
  0xe1   :  { %v90_v53 = vmul.f32 %v88_v50, %v34_v2  ;;  %v123_v55 = vrot.slane %v88_v50, %v118_v48 }
  0xe2   :  { %v93_v56 = vadd.f32 %v92_v52, %v91_v51 }
  0xe3   :  { %v98_v57 = vsel %vm45_vm0, %v90_v53, 0.0  ;;  %v124_v58 = vsel %vm107_vm1, %v123_v55, %v119_v54 }
  0xe4   :  { %v94_v59 = vrot.slane %v93_v56, 2  ;;  %v99_v60 = vrot.slane %v98_v57, 4  ;;  %127 = vst.msk [vmem:[#allocation7] sm:$0x3] %vm126_vm2, %v124_v58 }
  0xe5   :  { %204 = shalt.err (!%p201_p12)
}
  0xe6   :  { %s205_s9 = scalar_lea.hbm %s325_s4, 32 }
  0xe7   :  { %p206_p13 = scmp.ne.s32.totalorder %s325_s4, %s205_s9  ;;  %p209_p0 = scmp.lt.u32.totalorder %s205_s9, %s325_s4 }
  0xe9   :  { %p211_p1 = pnand %p209_p0, %p206_p13 }
  0xeb   :  { %214 = shalt.err (!%p211_p1)
}
  0xec   :  { %147 = dma.vmem_to_hbm [thread:$0]  %s145_s1, 32, %s325_s4, [#allocation8]   ;;  %v95_v61 = vadd.f32 %v94_v59, %v93_v56  ;;  %v100_v62 = vadd.f32 %v99_v60, %v98_v57  ;;  %vm110_vm3 = vcmask 254976  }
  0xed   :  { %s247_s16 = smov [#allocation6]  }
  0xee   :  { %v101_v63 = vrot.slane %v100_v62, 2  ;;  %v96_v0 = vrot.slane %v95_v61, 1  ;;  %s134_s17 = sshll.u32 %s247_s16, 4  ;;  %s135_s17 = int_to_ptr.vmem [resolvable:$true] %s134_s17 }
  0xef   :  { %s215_s18 = scalar_lea.vmem %s135_s17, 32  ;;  %p220_p3 = scmp.lt.s32.totalorder %s135_s17, %s135_s17 }
  0xf0   :  { %v102_v1 = vadd.f32 %v101_v63, %v100_v62  ;;  %v97_v3 = vadd.f32 %v96_v0, %v95_v61  ;;  %p216_p2 = scmp.ne.s32.totalorder %s135_s17, %s215_s18  ;;  %p221_p4 = scmp.lt.s32.totalorder %s215_s18, %s215_s18 }
  0xf2   :  { %v103_v2 = vrot.slane %v102_v1, 1  ;;  %p222_p5 = por %p221_p4, %p220_p3 }
  0xf4   :  { %v104_v4 = vadd.f32 %v103_v2, %v102_v1  ;;  %p223_p6 = pnand %p222_p5, %p216_p2 }
  0xf6   :  { %v108_v5 = vsel %vm107_vm1, %v104_v4, %v97_v3 }
  0xf7   :  { %111 = vst.msk [vmem:[#allocation6] sm:$0x3] %vm110_vm3, %v108_v5 }
  0xf8   :  { %226 = shalt.err (!%p223_p6)
}
  0xf9   :  { %s227_s20 = scalar_lea.hbm %s324_s3, 32 }
  0xfa   :  { %p228_p7 = scmp.ne.s32.totalorder %s324_s3, %s227_s20  ;;  %p231_p8 = scmp.lt.u32.totalorder %s227_s20, %s324_s3 }
  0xfc   :  { %p233_p9 = pnand %p231_p8, %p228_p7 }
  0xfe   :  { %236 = shalt.err (!%p233_p9)
}
  0xff   :  { %137 = dma.vmem_to_hbm [thread:$0]  %s135_s17, 32, %s324_s3, [#allocation5]  }
 0x100   :  { %239 = dma.done.wait [#allocation5], 32  }
 0x101   :  { %240 = vsyncadd [#allocation5], 4294967264 }
 0x102   :  { %241 = dma.done.wait [#allocation8], 32  }
 0x103   :  { %242 = vsyncadd [#allocation8], 4294967264 }
 0x104   :  { %154 = vsyncpa [#allocation4], 1 }
 0x105   :  { %155 = vsyncpa [#allocation5], 1 }
 0x106   :  { %156 = vsyncpa [#allocation8], 1 }

</bundles_post_ra>
